<compile_context>
chip_gen: v6e
topology: v6e:2x2x1
jax: 0.10.0
libtpu: 0.0.40
codegen_flags: <defaults>
</compile_context>

<pallas_src>
import math
from typing import NamedTuple

import jax
import jax.numpy as jnp
from jax import lax
from jax.experimental import pallas as pl
from jax.experimental.pallas import tpu as pltpu


_SQRT2 = math.sqrt(2.0)


def _gelu_erf(x):
    # GELU(x) = x * 0.5 * (1 + erf(x / sqrt(2)))  -- exact erf variant, matches the module
    return x * 0.5 * (1.0 + lax.erf(x / _SQRT2))


def _round_up(a, b):
    return (a + b - 1) // b * b


def _vmem_capacity_bytes():
    try:
        info = pltpu.get_tpu_info()
        cap = getattr(info, "vmem_capacity_bytes", None)
        if cap:
            return int(cap)
    except Exception:
        pass
    return 64 * 1024 * 1024  # conservative fallback (v7x per-TC VMEM)


def _footprint_bytes(tm, th, E_pad, itemsize):
    # double-buffered pipelined streams + f32 accumulator + in-body temporaries
    streams = 2 * (tm * E_pad + E_pad * 2 * th + th * E_pad + tm * E_pad) * itemsize
    acc = tm * E_pad * 4
    temps = tm * 2 * th * 4 + tm * th * itemsize  # h12 (f32) + act
    return streams + acc + temps


def ffn_kernel(x_ref, w12_ref, w2_ref, o_ref, acc_ref):
    # x_ref   : (tm, E_pad)        token tile (resident across the hidden axis)
    # w12_ref : (E_pad, 2*th)      fused [w1 | w_gate] hidden tile
    # w2_ref  : (th, E_pad)        down-projection hidden tile
    # o_ref   : (tm, E_pad)        output tile (resident across the hidden axis)
    # acc_ref : (tm, E_pad) f32    accumulator scratch
    h = pl.program_id(1)
    n_h = pl.num_programs(1)
    th = w2_ref.shape[0]

    x = x_ref[...]
    # one wide matmul covering both the up-projection and the gate for this hidden tile
    h12 = jnp.dot(x, w12_ref[...], preferred_element_type=jnp.float32)
    act = (_gelu_erf(h12[:, :th]) * h12[:, th:]).astype(w2_ref.dtype)
    part = jnp.dot(act, w2_ref[...], preferred_element_type=jnp.float32)

    is_first = h == 0
    is_last = h == n_h - 1

    @pl.when(jnp.logical_and(is_first, is_last))
    def _():  # single hidden step: write output directly, never touch acc
        o_ref[...] = part.astype(o_ref.dtype)

    @pl.when(jnp.logical_and(is_first, jnp.logical_not(is_last)))
    def _():  # first step: store partial directly (no zero-init + RMW)
        acc_ref[...] = part

    @pl.when(jnp.logical_and(jnp.logical_not(is_first), jnp.logical_not(is_last)))
    def _():  # middle steps: accumulate
        acc_ref[...] += part

    @pl.when(jnp.logical_and(jnp.logical_not(is_first), is_last))
    def _():  # last step: finalize from the value just computed (no extra acc store)
        o_ref[...] = (acc_ref[...] + part).astype(o_ref.dtype)


class PreparedFFN(NamedTuple):
    w12: jax.Array          # [E_pad, nH * 2 * th]  fused & padded [w1 | w_gate] blocks
    w2p: jax.Array          # [H_pad, E_pad]        padded down projection
    E: int
    H: int
    E_pad: int
    th: int
    tm_target: int
    m_align: int
    vmem_limit_bytes: int


def prepare_ffn_weights(w1, w_gate, w2):
    """Fuse + pad the FFN weights once (hoisted out of the per-call path).

    w1, w_gate: [E, H]; w2: [H, E]. Call once at weight-load time and cache the result;
    every forward call then only (maybe) pads the activations.
    """
    E, H = w1.shape
    itemsize = jnp.dtype(w1.dtype).itemsize

    vmem_cap = _vmem_capacity_bytes()
    budget = int(vmem_cap * 0.80)               # leave headroom for Mosaic scratch/semaphores
    big_vmem = vmem_cap >= 96 * 1024 * 1024     # v5e/v6e (128 MiB) vs v7x (64 MiB per TC)

    # sublane alignment for the token axis (native tile height per dtype)
    m_align = 8 if itemsize >= 4 else (16 if itemsize == 2 else 32)

    # token-tile target: large enough to clear the weight-streaming ridge (~650 flop/B on v6e)
    if itemsize <= 2:
        tm_target = 1024 if big_vmem else 512
    else:
        tm_target = 512 if big_vmem else 256

    E_pad = _round_up(E, 128)

    # When VMEM-constrained, shrink th first (keeps tm = weight-reuse intensity)...
    th = min(512, _round_up(H, 128))
    while th > 128 and _footprint_bytes(tm_target, th, E_pad, itemsize) > budget:
        th -= 128
    # ...and only touch tm as a last resort.
    while tm_target > max(256, m_align) and _footprint_bytes(tm_target, th, E_pad, itemsize) > budget:
        tm_target //= 2

    H_pad = _round_up(H, th)
    nH = H_pad // th

    # Zero-pad: GELU(0)*0 == 0, so padded hidden/emb columns contribute nothing.
    w1p = jnp.pad(w1, ((0, E_pad - E), (0, H_pad - H)))
    wgp = jnp.pad(w_gate, ((0, E_pad - E), (0, H_pad - H)))
    w2p = jnp.pad(w2, ((0, H_pad - H), (0, E_pad - E)))
    # Fused weight: block h (columns [h*2*th, (h+1)*2*th)) = [w1 block h | w_gate block h]
    w12 = jnp.concatenate(
        [w1p.reshape(E_pad, nH, th), wgp.reshape(E_pad, nH, th)], axis=2
    ).reshape(E_pad, nH * 2 * th)

    vmem_limit = min(int(vmem_cap * 0.85), 112 * 1024 * 1024)
    return PreparedFFN(w12, w2p, E, H, E_pad, th, tm_target, m_align, vmem_limit)


def ffn_pallas(x, prep: PreparedFFN):
    """x: [B, S, E] -> [B, S, E] using pre-fused / pre-padded weights."""
    B, S, E = x.shape
    assert E == prep.E, "embedding dim mismatch with prepared weights"
    dtype = x.dtype
    itemsize = jnp.dtype(dtype).itemsize
    M = B * S
    E_pad, th = prep.E_pad, prep.th
    nH = prep.w12.shape[1] // (2 * th)
    m_align = prep.m_align
    tm_target = prep.tm_target

    # Pick tm without over-padding M to a multiple of a huge tile.
    if M <= tm_target:
        tm = _round_up(M, m_align)
    else:
        tm = tm_target
        # shrink only while the tail tile would be mostly empty; keep tm >= 256 so the
        # kernel stays on the compute-bound side of the weight-streaming roofline
        while tm > 256 and _round_up(M, tm) - M > tm // 2:
            tm //= 2
    M_pad = _round_up(M, tm)

    # Ensure >=2 tiles on the "parallel" token axis so both TensorCores (v7x) get work.
    if M_pad // tm < 2:
        half = max(m_align, _round_up(tm // 2, m_align))
        if half < tm and _round_up(M, half) // half >= 2:
            tm = half
            M_pad = _round_up(M, tm)

    x2d = x.reshape(M, E)
    if M_pad != M or E_pad != E:   # skip the pad entirely when already aligned
        x2d = jnp.pad(x2d, ((0, M_pad - M), (0, E_pad - E)))

    n_m_tiles = M_pad // tm
    H_pad = nH * th
    w_itemsize = jnp.dtype(prep.w12.dtype).itemsize
    cost = pl.CostEstimate(
        flops=6 * M_pad * E_pad * H_pad,      # 2*M*E*H (lin1) + 2*M*E*H (gate) + 2*M*H*E (lin2)
        transcendentals=M_pad * H_pad,        # erf per hidden activation
        bytes_accessed=(x2d.size + M_pad * E_pad) * itemsize
        + n_m_tiles * (prep.w12.size + prep.w2p.size) * w_itemsize,  # weights re-streamed per token tile
    )

    out2d = pl.pallas_call(
        ffn_kernel,
        out_shape=jax.ShapeDtypeStruct((M_pad, E_pad), dtype),
        grid_spec=pltpu.PrefetchScalarGridSpec(
            num_scalar_prefetch=0,
            grid=(n_m_tiles, nH),
            in_specs=[
                pl.BlockSpec((tm, E_pad), lambda i, h: (i, 0)),       # x tile (resident over h)
                pl.BlockSpec((E_pad, 2 * th), lambda i, h: (0, h)),   # fused [w1|w_gate] hidden tile
                pl.BlockSpec((th, E_pad), lambda i, h: (h, 0)),       # w2 hidden tile
            ],
            out_specs=pl.BlockSpec((tm, E_pad), lambda i, h: (i, 0)),
            scratch_shapes=[pltpu.VMEM((tm, E_pad), jnp.float32)],
        ),
        compiler_params=pltpu.CompilerParams(
            dimension_semantics=("parallel", "arbitrary"),
            vmem_limit_bytes=prep.vmem_limit_bytes,
        ),
        cost_estimate=cost,
    )(x2d, prep.w12, prep.w2p)

    return out2d[:M, :E].reshape(B, S, E)


def ffn_forward(x, w1, w_gate, w2):
    # Convenience one-shot path; in real use, cache the prepared weights.
    return ffn_pallas(x, prepare_ffn_weights(w1, w_gate, w2))


def ffn_reference(x, w1, w_gate, w2):
    h1 = _gelu_erf(x @ w1)
    hg = x @ w_gate
    return (h1 * hg) @ w2


if __name__ == "__main__":
    # small config consistent with the module: emb_dim=32, hidden_dim=64
    B, S, E, H = 2, 8, 32, 64
    dtype = jnp.float32

    key = jax.random.PRNGKey(0)
    kx, k1, kg, k2 = jax.random.split(key, 4)

    # deterministic parameter init, ~ nn.Linear default scale (uniform +/- 1/sqrt(fan_in))
    bound1 = 1.0 / math.sqrt(E)
    bound2 = 1.0 / math.sqrt(H)
    x = jax.random.normal(kx, (B, S, E), dtype=dtype)
    w1 = jax.random.uniform(k1, (E, H), dtype=dtype, minval=-bound1, maxval=bound1)
    w_gate = jax.random.uniform(kg, (E, H), dtype=dtype, minval=-bound1, maxval=bound1)
    w2 = jax.random.uniform(k2, (H, E), dtype=dtype, minval=-bound2, maxval=bound2)

    prep = prepare_ffn_weights(w1, w_gate, w2)   # weight fusion/padding hoisted out of per-call path
    out = ffn_pallas(x, prep)
    out = jax.block_until_ready(out)

    ref = ffn_reference(x.astype(jnp.float32), w1, w_gate, w2)
    assert out.shape == (B, S, E)
    assert jnp.allclose(out, ref, atol=1e-4, rtol=1e-4), "mismatch vs reference"

    print("KERNEL_OK")
</pallas_src>

<mosaic_0001>
module attributes {stable_mosaic.version = 11 : i64} {
  func.func @ffn_kernel(%arg0: i32, %arg1: i32, %arg2: memref<8x128xf32, #tpu.memory_space<vmem>>, %arg3: memref<128x256xf32, #tpu.memory_space<vmem>>, %arg4: memref<128x128xf32, #tpu.memory_space<vmem>>, %arg5: memref<8x128xf32, #tpu.memory_space<vmem>>, %arg6: memref<8x128xf32, #tpu.memory_space<vmem>>) attributes {dimension_semantics = [#tpu.dimension_semantics<parallel>, #tpu.dimension_semantics<arbitrary>], iteration_bounds = array<i64: 2, 1>, scalar_prefetch = 0 : i64, scratch_operands = 1 : i64, tpu.core_type = #tpu.core_type<tc>, window_params = [{transform_indices = @transform_0, window_bounds = array<i64: 8, 128>}, {transform_indices = @transform_1, window_bounds = array<i64: 128, 256>}, {transform_indices = @transform_2, window_bounds = array<i64: 128, 128>}, {transform_indices = @transform_3, window_bounds = array<i64: 8, 128>}]} {
    %c0 = arith.constant 0 : index
    %c0_0 = arith.constant 0 : index
    %0 = vector.load %arg2[%c0, %c0_0] : memref<8x128xf32, #tpu.memory_space<vmem>>, vector<8x128xf32>
    %c0_1 = arith.constant 0 : index
    %c0_2 = arith.constant 0 : index
    %1 = vector.load %arg3[%c0_1, %c0_2] : memref<128x256xf32, #tpu.memory_space<vmem>>, vector<128x256xf32>
    %cst = arith.constant dense<0.000000e+00> : vector<8x256xf32>
    %2 = tpu.matmul %0, %1, %cst {dimension_numbers = #tpu.dot_dimension_numbers<[1], [0], [0], [1], [0, 0, 1, 1], [], []>} : vector<8x128xf32>, vector<128x256xf32>, vector<8x256xf32> -> vector<8x256xf32>
    %3 = vector.extract_strided_slice %2 {offsets = [0, 0], sizes = [8, 128], strides = [1, 1]} : vector<8x256xf32> to vector<8x128xf32>
    %cst_3 = arith.constant 5.000000e-01 : f32
    %4 = vector.broadcast %cst_3 : f32 to vector<8x128xf32>
    %5 = arith.mulf %3, %4 : vector<8x128xf32>
    %cst_4 = arith.constant 1.41421354 : f32
    %6 = vector.broadcast %cst_4 : f32 to vector<8x128xf32>
    %7 = arith.divf %3, %6 : vector<8x128xf32>
    %8 = math.erf %7 : vector<8x128xf32>
    %cst_5 = arith.constant 1.000000e+00 : f32
    %9 = vector.broadcast %cst_5 : f32 to vector<8x128xf32>
    %10 = arith.addf %9, %8 : vector<8x128xf32>
    %11 = arith.mulf %5, %10 : vector<8x128xf32>
    %12 = vector.extract_strided_slice %2 {offsets = [0, 128], sizes = [8, 128], strides = [1, 1]} : vector<8x256xf32> to vector<8x128xf32>
    %13 = arith.mulf %11, %12 : vector<8x128xf32>
    %c0_6 = arith.constant 0 : index
    %c0_7 = arith.constant 0 : index
    %14 = vector.load %arg4[%c0_6, %c0_7] : memref<128x128xf32, #tpu.memory_space<vmem>>, vector<128x128xf32>
    %cst_8 = arith.constant dense<0.000000e+00> : vector<8x128xf32>
    %15 = tpu.matmul %13, %14, %cst_8 {dimension_numbers = #tpu.dot_dimension_numbers<[1], [0], [0], [1], [0, 0, 1, 1], [], []>} : vector<8x128xf32>, vector<128x128xf32>, vector<8x128xf32> -> vector<8x128xf32>
    %c0_i32 = arith.constant 0 : i32
    %16 = arith.cmpi eq, %arg1, %c0_i32 : i32
    %c0_i32_9 = arith.constant 0 : i32
    %17 = arith.cmpi eq, %arg1, %c0_i32_9 : i32
    %18 = arith.andi %16, %17 : i1
    %19 = arith.extui %18 : i1 to i32
    %c0_i32_10 = arith.constant 0 : i32
    %20 = arith.cmpi ne, %19, %c0_i32_10 : i32
    scf.if %20 {
      %c0_17 = arith.constant 0 : index
      %c0_18 = arith.constant 0 : index
      %34 = vector.load %arg5[%c0_17, %c0_18] : memref<8x128xf32, #tpu.memory_space<vmem>>, vector<8x128xf32>
      tpu.vector_store %arg5[%c0_17, %c0_18], %15 {strides = array<i32>} : memref<8x128xf32, #tpu.memory_space<vmem>>, vector<8x128xf32>,
    } else {
    }
    %true = arith.constant true
    %21 = arith.xori %17, %true : i1
    %22 = arith.andi %16, %21 : i1
    %23 = arith.extui %22 : i1 to i32
    %c0_i32_11 = arith.constant 0 : i32
    %24 = arith.cmpi ne, %23, %c0_i32_11 : i32
    scf.if %24 {
      %c0_17 = arith.constant 0 : index
      %c0_18 = arith.constant 0 : index
      %34 = vector.load %arg6[%c0_17, %c0_18] : memref<8x128xf32, #tpu.memory_space<vmem>>, vector<8x128xf32>
      tpu.vector_store %arg6[%c0_17, %c0_18], %15 {strides = array<i32>} : memref<8x128xf32, #tpu.memory_space<vmem>>, vector<8x128xf32>,
    } else {
    }
    %true_12 = arith.constant true
    %25 = arith.xori %16, %true_12 : i1
    %true_13 = arith.constant true
    %26 = arith.xori %17, %true_13 : i1
    %27 = arith.andi %25, %26 : i1
    %28 = arith.extui %27 : i1 to i32
    %c0_i32_14 = arith.constant 0 : i32
    %29 = arith.cmpi ne, %28, %c0_i32_14 : i32
    scf.if %29 {
      %c0_17 = arith.constant 0 : index
      %c0_18 = arith.constant 0 : index
      %34 = vector.load %arg6[%c0_17, %c0_18] : memref<8x128xf32, #tpu.memory_space<vmem>>, vector<8x128xf32>
      %35 = arith.addf %34, %15 : vector<8x128xf32>
      %c0_19 = arith.constant 0 : index
      %c0_20 = arith.constant 0 : index
      %36 = vector.load %arg6[%c0_19, %c0_20] : memref<8x128xf32, #tpu.memory_space<vmem>>, vector<8x128xf32>
      tpu.vector_store %arg6[%c0_19, %c0_20], %35 {strides = array<i32>} : memref<8x128xf32, #tpu.memory_space<vmem>>, vector<8x128xf32>,
    } else {
    }
    %true_15 = arith.constant true
    %30 = arith.xori %16, %true_15 : i1
    %31 = arith.andi %30, %17 : i1
    %32 = arith.extui %31 : i1 to i32
    %c0_i32_16 = arith.constant 0 : i32
    %33 = arith.cmpi ne, %32, %c0_i32_16 : i32
    scf.if %33 {
      %c0_17 = arith.constant 0 : index
      %c0_18 = arith.constant 0 : index
      %34 = vector.load %arg6[%c0_17, %c0_18] : memref<8x128xf32, #tpu.memory_space<vmem>>, vector<8x128xf32>
      %35 = arith.addf %34, %15 : vector<8x128xf32>
      %c0_19 = arith.constant 0 : index
      %c0_20 = arith.constant 0 : index
      %36 = vector.load %arg5[%c0_19, %c0_20] : memref<8x128xf32, #tpu.memory_space<vmem>>, vector<8x128xf32>
      tpu.vector_store %arg5[%c0_19, %c0_20], %35 {strides = array<i32>} : memref<8x128xf32, #tpu.memory_space<vmem>>, vector<8x128xf32>,
    } else {
    }
    return
  }
  func.func @transform_0(%arg0: i32, %arg1: i32) -> (i32, i32) {
    %c0_i32 = arith.constant 0 : i32
    %c0_i32_0 = arith.constant 0 : i32
    return %arg0, %c0_i32 : i32, i32
  }
  func.func @transform_1(%arg0: i32, %arg1: i32) -> (i32, i32) {
    %c0_i32 = arith.constant 0 : i32
    %c0_i32_0 = arith.constant 0 : i32
    return %c0_i32, %arg1 : i32, i32
  }
  func.func @transform_2(%arg0: i32, %arg1: i32) -> (i32, i32) {
    %c0_i32 = arith.constant 0 : i32
    %c0_i32_0 = arith.constant 0 : i32
    return %arg1, %c0_i32 : i32, i32
  }
  func.func @transform_3(%arg0: i32, %arg1: i32) -> (i32, i32) {
    %c0_i32 = arith.constant 0 : i32
    %c0_i32_0 = arith.constant 0 : i32
    return %arg0, %c0_i32 : i32, i32
  }
}

</mosaic_0001>

<bundles_post_ra>
// kernel: tpu_custom_call.1
= control target key start
LH: loop header
LB: loop body
LE: loop exit
PB: predicated region body
PF: predicated region fallthrough
CT: control target
= control target key end

     0   :  { %8 = vsyncpa [#allocation4], 0  ;;  %s1146_s0 = inlined_call_operand.hbm [shape: f32[16,128], index: 0, kind: input, shape index: {}]   ;;  %s1147_s1 = inlined_call_operand.hbm [shape: f32[128,256], index: 1, kind: input, shape index: {}]   ;;  %s1148_s2 = inlined_call_operand.hbm [shape: f32[128,128], index: 2, kind: input, shape index: {}]   ;;  %s1149_s3 = inlined_call_operand.hbm [shape: f32[16,128], index: 3, kind: output, shape index: {}]  }
   0x1   :  { %10 = vsyncpa [#allocation4 + $0x1], 0 }
   0x2   :  { %11 = vsyncpa [#allocation7], 0 }
   0x3   :  { %12 = vsyncpa [#allocation5], 0 }
   0x4   :  { %14 = vsyncpa [#allocation5 + $0x1], 0  ;;  %s935_s12 = smov 0   ;;  %s937_s13 = smov 0  }
   0x5   :  { %s939_s14 = smov 0   ;;  %s941_s15 = smov 0  }
   0x6   :  { %s943_s16 = smov 0   ;;  %s945_s17 = smov 0  }
   0x7 LB: > { %s579_s18 = sadd.s32 4294967295, %s903_s17   ;;  %s580_s19 = sadd.s32 4294967294, %s903_s17   ;;  %s903_s17 = sphi %s945_s17, %s20_s17   ;;  %s899_s16 = sphi %s943_s16, %s1169_s16   ;;  %s895_s15 = sphi %s941_s15, %s1168_s15   ;;  %s891_s14 = sphi %s939_s14, %s1167_s14   ;;  %s887_s13 = sphi %s937_s13, %s1166_s13   ;;  %s883_s12 = sphi %s935_s12, %s1165_s12  }
   0x8   : > { %p52_p0 = scmp.ne.s32.totalorder %s887_s13, %s883_s12  ;;  %p969_p1 = scmp.eq.s32.totalorder %s579_s18, 0 }
   0x9   : > { %p973_p2 = scmp.eq.s32.totalorder %s579_s18, 1  ;;  %p134_p3 = scmp.eq.s32.totalorder %s580_s19, 1 }
   0xa   : > { %s1153_s20 = scalar_select %p969_p1, 1, 0 }
   0xb   : > { %p979_p4 = por %p969_p1, %p52_p0  ;;  %p581_p5 = scmp.ge.s32.totalorder %s903_s17, 1 }
   0xc   : > { %p984_p6 = por %p134_p3, %p52_p0  ;;  %p141_p7 = scmp.lt.s32.totalorder %s903_s17, 3 }
   0xd   : > { %s1155_s22 = scalar_select %p979_p4, 1, 0 }
   0xe   : > { %s1156_s23 = scalar_select %p984_p6, 1, 0 }
   0xf   : > { %p989_p8 = pnand %p581_p5, %p141_p7  ;;  %s905_s25 = smov [#allocation6]  }
  0x10   : > { %s156_s26 = sshll.u32 %s905_s25, 4  ;;  %s906_s28 = smov [#allocation8]   ;;  %s157_s26 = int_to_ptr.vmem [resolvable:$true] %s156_s26 }
  0x11   : > { %p660_p9 = pneg %p989_p8  ;;  %s172_s29 = sshll.u32 %s906_s28, 4  ;;  %s173_s29 = int_to_ptr.vmem [resolvable:$true] %s172_s29 }
  0x12   : > { %s750_s30 = scalar_lea.vmem %s157_s26, 4096  ;;  %p758_p5 = scmp.lt.s32.totalorder %s157_s26, %s157_s26 }
  0x13   : > { %p998_p11 = pnand %p660_p9, %p969_p1  ;;  %p751_p13 = scmp.ne.s32.totalorder %s157_s26, %s750_s30 }
  0x14   : > { %p759_p7 = scmp.lt.s32.totalorder %s750_s30, %s750_s30 }
  0x15   : > { %p741_p12 = pneg %p998_p11 }
  0x16   : > { %p760_p10 = por %p759_p7, %p758_p5 }
  0x17   : > { %p753_p0 = pnand %p751_p13, %p741_p12 }
  0x19   : > { %p754_p3 = pneg %p753_p0 }
  0x1b   : > { %p761_p9 = pnand %p760_p10, %p754_p3 }
  0x1d   : > { %764 = shalt.err (!%p761_p9)
}
  0x1e   : > { %s907_s4 = smov 256   ;;  %s908_s5 = smov 16  }
  0x1f   : > { %663 = dma.hbm_to_vmem [thread:$0]  (!%p998_p11), %s1147_s1, 4096, %s157_s26, [#allocation7], %s907_s4, %s907_s4, %s908_s5  }
  0x20   : > { %s776_s8 = scalar_lea.vmem %s173_s29, 2048  ;;  %p784_p1 = scmp.lt.s32.totalorder %s173_s29, %s173_s29 }
  0x21   : > { %p777_p6 = scmp.ne.s32.totalorder %s173_s29, %s776_s8  ;;  %p785_p4 = scmp.lt.s32.totalorder %s776_s8, %s776_s8 }
  0x23   : > { %p779_p13 = pnand %p777_p6, %p741_p12  ;;  %p786_p5 = por %p785_p4, %p784_p1 }
  0x25   : > { %p780_p0 = pneg %p779_p13 }
  0x27   : > { %p787_p10 = pnand %p786_p5, %p780_p0 }
  0x29   : > { %790 = shalt.err (!%p787_p10)
}
  0x2a   : > { %s909_s9 = smov 128   ;;  %s910_s10 = smov 8  }
  0x2b   : > { %666 = dma.hbm_to_vmem [thread:$0]  (!%p998_p11), %s1148_s2, 2048, %s173_s29, [#allocation7], %s909_s9, %s909_s9, %s910_s10  }
  0x2c   : > { %s32_s19 = sadd.s32 1, %s899_s16  ;;  %s39_s25 = sadd.s32 1, %s891_s14 }
  0x2d   : > { %p34_p1 = scmp.ge.s32.totalorder %s32_s19, 2  ;;  %p46_p4 = scmp.ne.s32.totalorder %s891_s14, %s887_s13 }
  0x2e   : > { %p47_p6 = scmp.eq.s32.totalorder %s903_s17, 0  ;;  %p677_p12 = scmp.lt.s32.totalorder %s903_s17, 2 }
  0x2f   : > { %s1171_s19 = smov (%p34_p1, %s32_s19), 0  ;;  %p1030_p7 = por %p973_p2, %p46_p4 }
  0x30   : > { %p48_p3 = por %p47_p6, %p46_p4  ;;  %s36_s27 = ssub.s32 %s899_s16, %s1171_s19 }
  0x31   : > { %s186_s28 = sand.u32 1, %s891_s14   ;;  %p37_p9 = scmp.eq.s32.totalorder %s36_s27, 0 }
  0x32   : > { %s585_s29 = sshll.u32 %s186_s28, 3  ;;  %s586_s30 = sshll.u32 %s899_s16, 7 }
  0x33   : > { %s1039_s4 = scalar_select %p37_p9, %s891_s14, %s39_s25  }
  0x34   : > { %s195_s7 = scalar_lea.hbm %s1146_s0, %s586_s30  ;;  %s190_s8 = scalar_lea.vmem [#allocation3], %s585_s29 }
  0x35   : > { %s197_s9 = sshll.u32 %s190_s8, 4  ;;  %p1046_p11 = pnand %p677_p12, %p48_p3  ;;  %s198_s9 = int_to_ptr.vmem [resolvable:$true] %s197_s9 }
  0x36   : > { %s187_s10 = scalar_lea.sflag [#allocation4], %s186_s28  ;;  %s804_s11 = scalar_lea.vmem %s198_s9, 128 }
  0x37   : > { %p793_p2 = pneg %p1046_p11  ;;  %p805_p13 = scmp.ne.s32.totalorder %s198_s9, %s804_s11 }
  0x38   : > { %s911_s18 = smov [#allocation3]  }
  0x39   : > { %p807_p0 = pnand %p805_p13, %p793_p2  ;;  %s809_s25 = sshll.u32 %s911_s18, 4  ;;  %s810_s25 = int_to_ptr.vmem [resolvable:$false] %s809_s25 }
  0x3a   : > { %s811_s27 = scalar_lea.vmem %s810_s25, 256  ;;  %p812_p10 = scmp.lt.s32.totalorder %s198_s9, %s810_s25 }
  0x3b   : > { %p808_p5 = pneg %p807_p0  ;;  %p813_p1 = scmp.lt.s32.totalorder %s811_s27, %s804_s11 }
  0x3d   : > { %p814_p4 = por %p813_p1, %p812_p10 }
  0x3f   : > { %p815_p6 = pnand %p814_p4, %p808_p5 }
  0x41   : > { %818 = shalt.err (!%p815_p6)
}
  0x42   : > { %670 = dma.hbm_to_vmem [thread:$0]  (!%p1046_p11), %s195_s7, 128, %s198_s9, %s187_s10  }
  0x43   : > { %206 = sbr.rel (%p989_p8) target bundleno = 532 (0x214), region = 32  ;;  %s1057_s28 = sand.u32 (!%p989_p8), 1, %s887_s13  }
  0x44   : > { %s588_s29 = sshll.u32 (!%p989_p8), %s1057_s28, 3  ;;  %s209_s30 = scalar_lea.sflag (!%p989_p8), [#allocation4], %s1057_s28 }
  0x45   : > { %s1063_s5 = scalar_lea.vmem (!%p989_p8), [#allocation3], %s588_s29  ;;  %p1161_p12 = scmp.ne.s32.totalorder (!%p989_p8), %s1155_s22, 0 }
  0x48   : > { %870 = dma.done.wait (%p1161_p12), %s209_s30, 128  }
  0x49   : > { %872 = vsyncadd (%p1161_p12), %s209_s30, 4294967168  ;;  %p1162_p3 = scmp.ne.s32.totalorder %s1153_s20, 0 }
  0x4b   : > { %874 = dma.done.wait (%p1162_p3), [#allocation7], 6144  }
  0x4c   : > { %876 = vsyncadd (%p1162_p3), [#allocation7], 4294961152  ;;  %v912_v0 = vmov 0.0   ;;  %v277_v1 = vld [vmem:[#allocation6 + $0xf8] sm:$0xff]  ;;  %v276_v2 = vld [vmem:[#allocation6 + $0xf0] sm:$0xff]  ;;  %vm913_vm0 = vmmov 0  }
  0x4d   : > { %342 = vmatprep.mubr.f32.mxu0 %v912_v0  ;;  %613 = vmatprep.subr.mxu1 %v912_v0  ;;  %v275_v3 = vld [vmem:[#allocation6 + $0xe8] sm:$0xff]  ;;  %v274_v4 = vld [vmem:[#allocation6 + $0xe0] sm:$0xff]  ;;  %v273_v5 = vld [vmem:[#allocation6 + $0xd8] sm:$0xff]  ;;  %s242_s20 = scalar_lea.vmem [#allocation9], %s588_s29  ;;  %s593_s24 = sshll.u32 %s895_s15, 7 }
  0x4e   : > { %278 = vmatprep.subr.mxu0 %v277_v1  ;;  %v272_v6 = vld [vmem:[#allocation6 + $0xd0] sm:$0xff]  ;;  %v271_v7 = vld [vmem:[#allocation6 + $0xc8] sm:$0xff]  ;;  %v270_v8 = vld [vmem:[#allocation6 + $0xc0] sm:$0xff]  ;;  %645 = vmatprep.mubr.msk.f32.mxu1 %vm913_vm0, %v912_v0  ;;  %s478_s22 = sshll.u32 %s242_s20, 4  ;;  %s1100_s8 = scalar_lea.hbm %s1149_s3, %s593_s24  ;;  %s1095_s22 = int_to_ptr.vmem [resolvable:$true] %s478_s22 }
  0x4f   : > { %279 = vmatpush1.msra.mxu0 %v276_v2  ;;  %v269_v9 = vld [vmem:[#allocation6 + $0xb8] sm:$0xff]  ;;  %v268_v10 = vld [vmem:[#allocation6 + $0xb0] sm:$0xff]  ;;  %v267_v11 = vld [vmem:[#allocation6 + $0xa8] sm:$0xff]  ;;  %s465_s9 = scalar_lea.sflag [#allocation5], %s1057_s28  ;;  %s819_s21 = scalar_lea.vmem %s1095_s22, 128 }
  0x50   : > { %280 = vmatprep.subr.mxu0 %v275_v3  ;;  %v266_v12 = vld [vmem:[#allocation6 + $0xa0] sm:$0xff]  ;;  %v265_v13 = vld [vmem:[#allocation6 + $0x98] sm:$0xff]  ;;  %v264_v14 = vld [vmem:[#allocation6 + $0x90] sm:$0xff]  ;;  %p820_p8 = scmp.ne.s32.totalorder %s1095_s22, %s819_s21  ;;  %s914_s15 = smov [#allocation9]  }
  0x51   : > { %281 = vmatpush1.msra.mxu0 %v274_v4  ;;  %v371_v15 = vld [vmem:[#allocation8 + $0x78] sm:$0xff]  ;;  %v370_v16 = vld [vmem:[#allocation8 + $0x70] sm:$0xff]  ;;  %v263_v17 = vld [vmem:[#allocation6 + $0x88] sm:$0xff]  ;;  %s823_s10 = sshll.u32 %s914_s15, 4  ;;  %s824_s10 = int_to_ptr.vmem [resolvable:$false] %s823_s10 }
  0x52   : > { %282 = vmatprep.subr.mxu0 %v273_v5  ;;  %614 = vmatpush3.msra.mxu1 %v371_v15  ;;  %v262_v18 = vld [vmem:[#allocation6 + $0x80] sm:$0xff]  ;;  %v369_v19 = vld [vmem:[#allocation8 + $0x68] sm:$0xff]  ;;  %v261_v20 = vld [vmem:[#allocation6 + $0x78] sm:$0xff]  ;;  %p821_p9 = pnand %p820_p8, %p1030_p7  ;;  %s825_s11 = scalar_lea.vmem %s824_s10, 256 }
  0x53   : > { %283 = vmatpush1.msra.mxu0 %v272_v6  ;;  %615 = vmatprep.subr.mxu1 %v912_v0  ;;  %v260_v21 = vld [vmem:[#allocation6 + $0x70] sm:$0xff]  ;;  %v368_v22 = vld [vmem:[#allocation8 + $0x60] sm:$0xff]  ;;  %v259_v23 = vld [vmem:[#allocation6 + $0x68] sm:$0xff]  ;;  %p826_p2 = scmp.lt.s32.totalorder %s1095_s22, %s824_s10  ;;  %p827_p13 = scmp.lt.s32.totalorder %s825_s11, %s819_s21 }
  0x54   : > { %284 = vmatprep.subr.mxu0 %v271_v7  ;;  %616 = vmatpush3.msra.mxu1 %v370_v16  ;;  %v258_v24 = vld [vmem:[#allocation6 + $0x60] sm:$0xff]  ;;  %v257_v25 = vld [vmem:[#allocation6 + $0x58] sm:$0xff]  ;;  %v256_v26 = vld [vmem:[#allocation6 + $0x50] sm:$0xff]  ;;  %p822_p11 = pneg %p821_p9 }
  0x55   : > { %285 = vmatpush1.msra.mxu0 %v270_v8  ;;  %617 = vmatprep.subr.mxu1 %v912_v0  ;;  %v255_v27 = vld [vmem:[#allocation6 + $0x48] sm:$0xff]  ;;  %v254_v28 = vld [vmem:[#allocation6 + $0x40] sm:$0xff]  ;;  %v253_v29 = vld [vmem:[#allocation6 + $0x38] sm:$0xff]  ;;  %p828_p0 = por %p827_p13, %p826_p2 }
  0x56   : > { %286 = vmatprep.subr.mxu0 %v269_v9  ;;  %618 = vmatpush3.msra.mxu1 %v369_v19  ;;  %v252_v30 = vld [vmem:[#allocation6 + $0x30] sm:$0xff]  ;;  %v251_v31 = vld [vmem:[#allocation6 + $0x28] sm:$0xff]  ;;  %v250_v32 = vld [vmem:[#allocation6 + $0x20] sm:$0xff] }
  0x57   : > { %287 = vmatpush1.msra.mxu0 %v268_v10  ;;  %619 = vmatprep.subr.mxu1 %v912_v0  ;;  %v249_v33 = vld [vmem:[#allocation6 + $0x18] sm:$0xff]  ;;  %v248_v34 = vld [vmem:[#allocation6 + $0x10] sm:$0xff]  ;;  %v247_v35 = vld [vmem:[#allocation6 + $0x8] sm:$0xff]  ;;  %p829_p5 = pnand %p828_p0, %p822_p11 }
  0x58   : > { %288 = vmatprep.subr.mxu0 %v267_v11  ;;  %620 = vmatpush3.msra.mxu1 %v368_v22  ;;  %v246_v36 = vld [vmem:[#allocation6] sm:$0xff]  ;;  %v245_v37 = vld [vmem:[%s1063_s5] sm:$0xff]  ;;  %v365_v40 = vld [vmem:[#allocation8 + $0x48] sm:$0xff] }
  0x59   : > { %289 = vmatpush1.msra.mxu0 %v266_v12  ;;  %621 = vmatprep.subr.mxu1 %v912_v0  ;;  %v367_v38 = vld [vmem:[#allocation8 + $0x58] sm:$0xff]  ;;  %v366_v39 = vld [vmem:[#allocation8 + $0x50] sm:$0xff]  ;;  %v364_v41 = vld [vmem:[#allocation8 + $0x40] sm:$0xff] }
  0x5a   : > { %290 = vmatprep.subr.mxu0 %v265_v13  ;;  %622 = vmatpush3.msra.mxu1 %v367_v38  ;;  %v363_v42 = vld [vmem:[#allocation8 + $0x38] sm:$0xff]  ;;  %v362_v43 = vld [vmem:[#allocation8 + $0x30] sm:$0xff]  ;;  %v361_v44 = vld [vmem:[#allocation8 + $0x28] sm:$0xff] }
  0x5b   : > { %291 = vmatpush1.msra.mxu0 %v264_v14  ;;  %623 = vmatprep.subr.mxu1 %v912_v0  ;;  %v360_v45 = vld [vmem:[#allocation8 + $0x20] sm:$0xff]  ;;  %v359_v46 = vld [vmem:[#allocation8 + $0x18] sm:$0xff]  ;;  %v358_v47 = vld [vmem:[#allocation8 + $0x10] sm:$0xff] }
  0x5c   : > { %292 = vmatprep.subr.mxu0 %v263_v17  ;;  %624 = vmatpush3.msra.mxu1 %v366_v39  ;;  %v357_v48 = vld [vmem:[#allocation8 + $0x8] sm:$0xff]  ;;  %v356_v49 = vld [vmem:[#allocation8] sm:$0xff] }
  0x5d   : > { %293 = vmatpush1.msra.mxu0 %v262_v18  ;;  %625 = vmatprep.subr.mxu1 %v912_v0 }
  0x5e   : > { %294 = vmatprep.subr.mxu0 %v261_v20  ;;  %626 = vmatpush3.msra.mxu1 %v365_v40 }
  0x5f   : > { %295 = vmatpush1.msra.mxu0 %v260_v21  ;;  %627 = vmatprep.subr.mxu1 %v912_v0 }
  0x60   : > { %296 = vmatprep.subr.mxu0 %v259_v23  ;;  %628 = vmatpush3.msra.mxu1 %v364_v41 }
  0x61   : > { %297 = vmatpush1.msra.mxu0 %v258_v24  ;;  %629 = vmatprep.subr.mxu1 %v912_v0 }
  0x62   : > { %298 = vmatprep.subr.mxu0 %v257_v25  ;;  %630 = vmatpush3.msra.mxu1 %v363_v42 }
  0x63   : > { %299 = vmatpush1.msra.mxu0 %v256_v26  ;;  %631 = vmatprep.subr.mxu1 %v912_v0 }
  0x64   : > { %300 = vmatprep.subr.mxu0 %v255_v27  ;;  %632 = vmatpush3.msra.mxu1 %v362_v43 }
  0x65   : > { %301 = vmatpush1.msra.mxu0 %v254_v28  ;;  %633 = vmatprep.subr.mxu1 %v912_v0 }
  0x66   : > { %302 = vmatprep.subr.mxu0 %v253_v29  ;;  %634 = vmatpush3.msra.mxu1 %v361_v44 }
  0x67   : > { %303 = vmatpush1.msra.mxu0 %v252_v30  ;;  %635 = vmatprep.subr.mxu1 %v912_v0 }
  0x68   : > { %304 = vmatprep.subr.mxu0 %v251_v31  ;;  %636 = vmatpush3.msra.mxu1 %v360_v45 }
  0x69   : > { %305 = vmatpush1.msra.mxu0 %v250_v32  ;;  %637 = vmatprep.subr.mxu1 %v912_v0 }
  0x6a   : > { %306 = vmatprep.subr.mxu0 %v249_v33  ;;  %638 = vmatpush3.msra.mxu1 %v359_v46 }
  0x6b   : > { %307 = vmatpush1.msra.mxu0 %v248_v34  ;;  %639 = vmatprep.subr.mxu1 %v912_v0 }
  0x6c   : > { %308 = vmatprep.subr.mxu0 %v247_v35  ;;  %640 = vmatpush3.msra.mxu1 %v358_v47 }
  0x6d   : > { %309 = vmatpush1.msra.mxu0 %v246_v36  ;;  %641 = vmatprep.subr.mxu1 %v912_v0 }
  0x6e   : > { %343 = vmatmul.mubr.f32.vlgmr.msra.gmra.mxu0 %v245_v37  ;;  %642 = vmatpush3.msra.mxu1 %v357_v48 }
  0x6f   : > { %643 = vmatprep.subr.mxu1 %v912_v0 }
  0x70   : > { %644 = vmatpush3.msra.mxu1 %v356_v49 }
 0x12e   : > { %v344_v50 = vpop.f32.mrf.mxu0 }
 0x12f   : > { %v351_v51 = vmul.f32 0.70710677, %v344_v50  ;;  %v349_v53 = vmul.f32 0.5, %v344_v50 }
 0x130   : > { %v346_v56 = vpop.f32.mrf.mxu0 }
 0x131   : > { %737 = verf.f32 %v351_v51 }
 0x13e   : > { %v738_v52 = vpop.eup %737 }
 0x13f   : > { %v353_v54 = vadd.f32 1.0, %v738_v52 }
 0x141   : > { %v354_v55 = vmul.f32 %v353_v54, %v349_v53 }
 0x143   : > { %v355_v57 = vmul.f32 %v354_v55, %v346_v56 }
 0x145   : > { %646 = vmatmul.mubr.f32.vlgmr.msra.gmra.mxu1 %v355_v57 }
 0x205   : > { %v438_v58 = vpop.f32.mrf.mxu1 }
 0x206   : > { %446 = vst [vmem:[%s242_s20] sm:$0xff] %v438_v58 }
 0x207   : > { %v647_v59 = vpop.f32.mrf.mxu1 }
 0x208   : > { %832 = shalt.err (!%p829_p5)
}
 0x209   : > { %s833_s18 = scalar_lea.hbm %s1100_s8, 128  ;;  %s837_s28 = scalar_lea.hbm %s1149_s3, 256 }
 0x20a   : > { %p834_p10 = scmp.ne.s32.totalorder %s1100_s8, %s833_s18  ;;  %p838_p6 = scmp.lt.s32.totalorder %s1100_s8, %s1149_s3 }
 0x20b   : > { %p839_p12 = scmp.lt.s32.totalorder %s837_s28, %s833_s18 }
 0x20c   : > { %p835_p1 = pnand %p834_p10, %p1030_p7 }
 0x20d   : > { %p840_p3 = por %p839_p12, %p838_p6 }
 0x20e   : > { %p836_p4 = pneg %p835_p1 }
 0x210   : > { %p841_p8 = pnand %p840_p3, %p836_p4 }
 0x212   : > { %844 = shalt.err (!%p841_p8)
}
 0x213   : > { %658 = dma.vmem_to_hbm [thread:$0]  (%p1030_p7), %s1095_s22, 128, %s1100_s8, %s465_s9  }
 0x214 PF: > { %s490_s5 = sand.u32 1, %s883_s12   ;;  %p1163_p9 = scmp.ne.s32.totalorder %s1156_s23, 0 }
 0x215   : > { %p1164_p11 = scmp.ge.s32.totalorder %s903_s17, 2  ;;  %s491_s20 = scalar_lea.sflag [#allocation5], %s490_s5 }
 0x217   : > { %p672_p2 = pnand %p1164_p11, %p1163_p9 }
 0x219   : > { %p673_p13 = pneg %p672_p2 }
 0x21b   : > { %878 = dma.done.wait (%p673_p13), %s491_s20, 128  }
 0x21c   : > { %880 = vsyncadd (%p673_p13), %s491_s20, 4294967168  ;;  %s20_s17 = sadd.s32 1, %s903_s17   ;;  %s1165_s12 = smov %s887_s13 }
 0x21d   : > { %p17_p0 = scmp.ge.s32.totalorder %s20_s17, 4   ;;  %s1166_s13 = smov %s891_s14 }
 0x21e   : > { %s1167_s14 = smov %s1039_s4  ;;  %s1168_s15 = smov %s899_s16 }
 0x21f   : > { %s1169_s16 = smov %s1171_s19  ;;  %19 = sbr.rel (!%p17_p0) target bundleno = 7 (0x7), region = 103 }
 0x224   :  { %496 = vsyncpa [#allocation4], 1 }
 0x225   :  { %498 = vsyncpa [#allocation4 + $0x1], 1 }
 0x226   :  { %499 = vsyncpa [#allocation7], 1 }
 0x227   :  { %500 = vsyncpa [#allocation5], 1 }
 0x228   :  { %502 = vsyncpa [#allocation5 + $0x1], 1 }

</bundles_post_ra>
